<compile_context>
chip_gen: v5e
topology: v5e:2x2
jax: 0.10.0
libtpu: 0.0.40
codegen_flags: <defaults>
</compile_context>

<pallas_src>
import math

import jax
import jax.numpy as jnp
from jax.experimental import pallas as pl
from jax.experimental.pallas import tpu as pltpu


def _round_up(x, m):
    return (x + m - 1) // m * m


# ----------------------------- kernels ------------------------------------

def _make_two_part_kernel(dt, compute_dtype):
    """Inputs t, f kept separate: feature stored via sliced writes, fc1 split."""

    def kernel(t_ref, f_ref, w1t_ref, w1f_ref, b1_ref, w2_ref, b2_ref,
               w3_ref, b3_ref, feat_ref, out_ref):
        tb = t_ref[...]
        fb = f_ref[...]

        # feature = concat(t, f) written as two sliced stores (no relayout).
        feat_ref[:, :dt] = tb.astype(feat_ref.dtype)
        feat_ref[:, dt:] = fb.astype(feat_ref.dtype)

        # fc1 split across the concat boundary: x@w1 == t@w1_t + f@w1_f.
        h = (jnp.dot(tb.astype(compute_dtype), w1t_ref[...],
                     preferred_element_type=jnp.float32)
             + jnp.dot(fb.astype(compute_dtype), w1f_ref[...],
                       preferred_element_type=jnp.float32)
             + b1_ref[...])
        h = jnp.maximum(h, 0.0)
        h = jnp.dot(h.astype(compute_dtype), w2_ref[...],
                    preferred_element_type=jnp.float32) + b2_ref[...]
        h = jnp.maximum(h, 0.0)
        y = jnp.dot(h.astype(compute_dtype), w3_ref[...],
                    preferred_element_type=jnp.float32) + b3_ref[...]
        out_ref[...] = y.astype(out_ref.dtype)

    return kernel


def _make_single_kernel(compute_dtype):
    """f is None path: feature == t so only logits are produced."""

    def kernel(t_ref, w1_ref, b1_ref, w2_ref, b2_ref, w3_ref, b3_ref, out_ref):
        x = t_ref[...].astype(compute_dtype)
        h = jnp.dot(x, w1_ref[...],
                    preferred_element_type=jnp.float32) + b1_ref[...]
        h = jnp.maximum(h, 0.0)
        h = jnp.dot(h.astype(compute_dtype), w2_ref[...],
                    preferred_element_type=jnp.float32) + b2_ref[...]
        h = jnp.maximum(h, 0.0)
        y = jnp.dot(h.astype(compute_dtype), w3_ref[...],
                    preferred_element_type=jnp.float32) + b3_ref[...]
        out_ref[...] = y.astype(out_ref.dtype)

    return kernel


# --------------------------- tiling helpers --------------------------------

_TM_CANDIDATES = (1024, 512, 256, 128, 64, 32, 16, 8)
_PER_STEP_OVERHEAD_BYTES = 400_000  # ~0.35us grid-step overhead @ ~1.1 TB/s


def _choose_tm(B, row_bytes, avail_tile_bytes):
    """Pick a batch tile minimizing pad bytes + per-step overhead, VMEM-bounded."""
    b8 = _round_up(max(B, 1), 8)
    cands = [tm for tm in _TM_CANDIDATES
             if tm <= b8 and 2 * tm * row_bytes <= avail_tile_bytes]
    if not cands:
        cands = [8]

    def cost(tm):
        b_pad = _round_up(B, tm)
        steps = b_pad // tm
        c = (b_pad - B) * row_bytes + steps * _PER_STEP_OVERHEAD_BYTES
        # v7x has 2 TensorCores; prefer >=2 "parallel" grid steps when possible.
        if steps < 2 and b8 >= 16:
            c += B * row_bytes // 2
        return c

    return min(cands, key=cost)


def _vmem_capacity_bytes():
    try:
        info = pltpu.get_tpu_info()
        cap = getattr(info, "vmem_capacity_bytes", None)
        if cap:
            return int(cap)
    except Exception:
        pass
    return 64 * 2 ** 20  # conservative fallback (v7x per-TC VMEM)


# ------------------------------ wrapper -------------------------------------

def classifier_forward(t, f, params, *, compute_dtype=jnp.bfloat16):
    """Mirrors Classifier.forward(t, f) -> (feature, logits) as one fused Pallas call."""
    w1, b1, w2, b2, w3, b3 = params
    t_in = t
    B, Dt = t.shape

    has_f = f is not None
    if has_f:
        feat_dtype = jnp.promote_types(t.dtype, f.dtype)
        t = t.astype(feat_dtype)
        f = f.astype(feat_dtype)
        Df = f.shape[1]
    else:
        feat_dtype = t.dtype
        Df = 0

    D = Dt + Df
    H1, H2 = w1.shape[1], w2.shape[1]
    C = w3.shape[1]
    assert w1.shape[0] == D, "fc1 fan_in must equal concatenated feature width"

    # bf16 matmul operands (native MXU path); biases stay f32 (added to f32 acc).
    w1 = w1.astype(compute_dtype)
    w2 = w2.astype(compute_dtype)
    w3 = w3.astype(compute_dtype)
    b1 = b1.astype(jnp.float32)
    b2 = b2.astype(jnp.float32)
    b3 = b3.astype(jnp.float32)

    # Lane-dense logits: zero-pad fc3 columns to a multiple of 128 so the
    # output store is an unmasked full-lane vst; slice back after the call.
    C_pad = _round_up(C, 128)
    if C_pad != C:
        w3 = jnp.pad(w3, ((0, 0), (0, C_pad - C)))
        b3 = jnp.pad(b3, ((0, 0), (0, C_pad - C)))

    if has_f:
        weight_args = (w1[:Dt], w1[Dt:], b1, w2, b2, w3, b3)
    else:
        weight_args = (w1, b1, w2, b2, w3, b3)

    # ---- VMEM budget / batch tile selection -------------------------------
    vmem_budget = _vmem_capacity_bytes() * 3 // 4  # headroom for compiler scratch
    w_bytes = sum(math.prod(a.shape) * jnp.dtype(a.dtype).itemsize
                  for a in weight_args)

    feat_isz = jnp.dtype(feat_dtype).itemsize
    # Per-row HBM traffic (inputs + feature writeback + logits) plus f32
    # intermediates kept live in VMEM/vregs.
    row_io_bytes = D * feat_isz + C_pad * 4 + (D * feat_isz if has_f else 0)
    scratch_per_row = 4 * (D + H1 + H2 + C_pad)
    row_bytes = row_io_bytes + scratch_per_row

    # Weights are double-buffered by the pipeline even with a constant
    # index_map -> budget them at 2x.
    # TODO(synk): pipeline_mode=pl.Buffered(1) on the weight specs would save
    #             the second buffer once single-buffering is proven stable.
    avail_tile_bytes = max(vmem_budget - 2 * w_bytes, 2 * 8 * row_bytes)
    TM = _choose_tm(B, row_bytes, avail_tile_bytes)

    B_pad = _round_up(B, TM)
    if B_pad != B:
        t = jnp.pad(t, ((0, B_pad - B), (0, 0)))
        if has_f:
            f = jnp.pad(f, ((0, B_pad - B), (0, 0)))
    grid = (B_pad // TM,)

    # ---- specs -------------------------------------------------------------
    acts = [t] + ([f] if has_f else [])
    act_specs = [pl.BlockSpec((TM, a.shape[1]), lambda i: (i, 0)) for a in acts]
    weight_specs = [pl.BlockSpec(a.shape, lambda i: (0, 0)) for a in weight_args]

    out_specs = []
    out_shape = []
    if has_f:
        out_specs.append(pl.BlockSpec((TM, D), lambda i: (i, 0)))
        out_shape.append(jax.ShapeDtypeStruct((B_pad, D), feat_dtype))
    out_specs.append(pl.BlockSpec((TM, C_pad), lambda i: (i, 0)))
    out_shape.append(jax.ShapeDtypeStruct((B_pad, C_pad), jnp.float32))

    kernel = (_make_two_part_kernel(Dt, compute_dtype) if has_f
              else _make_single_kernel(compute_dtype))

    vmem_need = 2 * w_bytes + 2 * TM * row_io_bytes + TM * scratch_per_row
    vmem_limit = int(min(vmem_budget, max(2 * vmem_need, 16 * 2 ** 20)))

    flops = 2 * B_pad * (D * H1 + H1 * H2 + H2 * C_pad)
    bytes_accessed = (w_bytes + B_pad * D * feat_isz + B_pad * C_pad * 4
                      + (B_pad * D * feat_isz if has_f else 0))

    outs = pl.pallas_call(
        kernel,
        grid=grid,
        in_specs=act_specs + weight_specs,
        out_specs=out_specs,
        out_shape=out_shape,
        compiler_params=pltpu.CompilerParams(
            dimension_semantics=("parallel",),
            vmem_limit_bytes=vmem_limit),
        cost_estimate=pl.CostEstimate(flops=flops, transcendentals=0,
                                      bytes_accessed=bytes_accessed),
    )(*acts, *weight_args)

    if has_f:
        feat_pad, logits_pad = outs
        return feat_pad[:B], logits_pad[:B, :C]
    # f is None: feature == t bit-for-bit; skip the redundant HBM round-trip.
    (logits_pad,) = outs
    return t_in, logits_pad[:B, :C]


# ------------------------------ params / ref --------------------------------

def init_params(key, in_features, num_classes):
    """Matches the lazily-built fc1/fc2/fc3 shapes.

    PyTorch nn.Linear default init: U(-1/sqrt(fan_in), 1/sqrt(fan_in)).
    Weights stored as [in, out] (transposed vs. PyTorch's [out, in]).
    """
    h1 = in_features // 2
    h2 = in_features // 4

    def linear(k, fan_in, fan_out):
        kw, kb = jax.random.split(k)
        bound = 1.0 / math.sqrt(fan_in)
        w = jax.random.uniform(kw, (fan_in, fan_out), jnp.float32, -bound, bound)
        b = jax.random.uniform(kb, (1, fan_out), jnp.float32, -bound, bound)
        return w, b

    k1, k2, k3 = jax.random.split(key, 3)
    w1, b1 = linear(k1, in_features, h1)
    w2, b2 = linear(k2, h1, h2)
    w3, b3 = linear(k3, h2, num_classes)
    return (w1, b1, w2, b2, w3, b3)


def _ref_forward(t, f, params, compute_dtype=jnp.bfloat16):
    """Pure-JAX reference using the same bf16-operand / f32-accumulate math."""
    w1, b1, w2, b2, w3, b3 = params
    feat = jnp.concatenate([t, f], axis=1) if f is not None else t
    h = jnp.dot(feat.astype(compute_dtype), w1.astype(compute_dtype),
                preferred_element_type=jnp.float32) + b1
    h = jnp.maximum(h, 0.0)
    h = jnp.dot(h.astype(compute_dtype), w2.astype(compute_dtype),
                preferred_element_type=jnp.float32) + b2
    h = jnp.maximum(h, 0.0)
    logits = jnp.dot(h.astype(compute_dtype), w3.astype(compute_dtype),
                     preferred_element_type=jnp.float32) + b3
    return feat, logits


# ------------------------------- demo ---------------------------------------

if __name__ == "__main__":
    key = jax.random.PRNGKey(0)
    kt, kf, kp, kp2 = jax.random.split(key, 4)

    # Small demo shapes: B=24 exercises multi-step grid + ragged-batch padding.
    B, Dt, Df = 24, 128, 128
    num_classes = 4

    t = jax.random.normal(kt, (B, Dt), jnp.float32)
    f = jax.random.normal(kf, (B, Df), jnp.float32)

    # --- path 1: f provided ---
    params = init_params(kp, Dt + Df, num_classes)
    feature, logits = classifier_forward(t, f, params)
    jax.block_until_ready((feature, logits))

    ref_feat, ref_logits = _ref_forward(t, f, params)
    assert feature.shape == (B, Dt + Df) and logits.shape == (B, num_classes)
    assert jnp.array_equal(feature, ref_feat)
    assert jnp.allclose(logits, ref_logits, atol=2e-2, rtol=2e-2)

    # --- path 2: f is None (feature is passed through, no kernel writeback) ---
    params2 = init_params(kp2, Dt, num_classes)
    feature2, logits2 = classifier_forward(t, None, params2)
    jax.block_until_ready((feature2, logits2))

    ref_feat2, ref_logits2 = _ref_forward(t, None, params2)
    assert feature2.shape == (B, Dt) and logits2.shape == (B, num_classes)
    assert jnp.array_equal(feature2, ref_feat2)
    assert jnp.allclose(logits2, ref_logits2, atol=2e-2, rtol=2e-2)

    print("KERNEL_OK")
</pallas_src>

<mosaic_0001>
module attributes {stable_mosaic.version = 11 : i64} {
  func.func @kernel(%arg0: i32, %arg1: memref<16x128xf32, #tpu.memory_space<vmem>>, %arg2: memref<16x128xf32, #tpu.memory_space<vmem>>, %arg3: memref<128x128xbf16, #tpu.memory_space<vmem>>, %arg4: memref<128x128xbf16, #tpu.memory_space<vmem>>, %arg5: memref<1x128xf32, #tpu.memory_space<vmem>>, %arg6: memref<128x64xbf16, #tpu.memory_space<vmem>>, %arg7: memref<1x64xf32, #tpu.memory_space<vmem>>, %arg8: memref<64x128xbf16, #tpu.memory_space<vmem>>, %arg9: memref<1x128xf32, #tpu.memory_space<vmem>>, %arg10: memref<16x256xf32, #tpu.memory_space<vmem>>, %arg11: memref<16x128xf32, #tpu.memory_space<vmem>>) attributes {dimension_semantics = [#tpu.dimension_semantics<parallel>], iteration_bounds = array<i64: 2>, scalar_prefetch = 0 : i64, scratch_operands = 0 : i64, tpu.core_type = #tpu.core_type<tc>, window_params = [{transform_indices = @transform_0, window_bounds = array<i64: 16, 128>}, {transform_indices = @transform_1, window_bounds = array<i64: 16, 128>}, {pipeline_mode = #tpu.pipeline_mode<synchronous>, transform_indices = @transform_2, window_bounds = array<i64: 128, 128>}, {pipeline_mode = #tpu.pipeline_mode<synchronous>, transform_indices = @transform_3, window_bounds = array<i64: 128, 128>}, {pipeline_mode = #tpu.pipeline_mode<synchronous>, transform_indices = @transform_4, window_bounds = array<i64: 1, 128>}, {pipeline_mode = #tpu.pipeline_mode<synchronous>, transform_indices = @transform_5, window_bounds = array<i64: 128, 64>}, {pipeline_mode = #tpu.pipeline_mode<synchronous>, transform_indices = @transform_6, window_bounds = array<i64: 1, 64>}, {pipeline_mode = #tpu.pipeline_mode<synchronous>, transform_indices = @transform_7, window_bounds = array<i64: 64, 128>}, {pipeline_mode = #tpu.pipeline_mode<synchronous>, transform_indices = @transform_8, window_bounds = array<i64: 1, 128>}, {transform_indices = @transform_9, window_bounds = array<i64: 16, 256>}, {transform_indices = @transform_10, window_bounds = array<i64: 16, 128>}]} {
    %c0 = arith.constant 0 : index
    %c0_0 = arith.constant 0 : index
    %0 = vector.load %arg1[%c0, %c0_0] : memref<16x128xf32, #tpu.memory_space<vmem>>, vector<16x128xf32>
    %c0_1 = arith.constant 0 : index
    %c0_2 = arith.constant 0 : index
    %1 = vector.load %arg2[%c0_1, %c0_2] : memref<16x128xf32, #tpu.memory_space<vmem>>, vector<16x128xf32>
    %c0_3 = arith.constant 0 : index
    %c0_4 = arith.constant 0 : index
    %2 = vector.load %arg10[%c0_3, %c0_4] : memref<16x256xf32, #tpu.memory_space<vmem>>, vector<16x128xf32>
    tpu.vector_store %arg10[%c0_3, %c0_4], %0 {strides = array<i32>} : memref<16x256xf32, #tpu.memory_space<vmem>>, vector<16x128xf32>,
    %c0_5 = arith.constant 0 : index
    %c128 = arith.constant 128 : index
    %3 = vector.load %arg10[%c0_5, %c128] : memref<16x256xf32, #tpu.memory_space<vmem>>, vector<16x128xf32>
    tpu.vector_store %arg10[%c0_5, %c128], %1 {strides = array<i32>} : memref<16x256xf32, #tpu.memory_space<vmem>>, vector<16x128xf32>,
    %4 = arith.truncf %0 : vector<16x128xf32> to vector<16x128xbf16>
    %c0_6 = arith.constant 0 : index
    %c0_7 = arith.constant 0 : index
    %5 = vector.load %arg3[%c0_6, %c0_7] : memref<128x128xbf16, #tpu.memory_space<vmem>>, vector<128x128xbf16>
    %cst = arith.constant dense<0.000000e+00> : vector<16x128xf32>
    %6 = tpu.matmul %4, %5, %cst {dimension_numbers = #tpu.dot_dimension_numbers<[1], [0], [0], [1], [0, 0, 1, 1], [], []>} : vector<16x128xbf16>, vector<128x128xbf16>, vector<16x128xf32> -> vector<16x128xf32>
    %7 = arith.truncf %1 : vector<16x128xf32> to vector<16x128xbf16>
    %c0_8 = arith.constant 0 : index
    %c0_9 = arith.constant 0 : index
    %8 = vector.load %arg4[%c0_8, %c0_9] : memref<128x128xbf16, #tpu.memory_space<vmem>>, vector<128x128xbf16>
    %cst_10 = arith.constant dense<0.000000e+00> : vector<16x128xf32>
    %9 = tpu.matmul %7, %8, %cst_10 {dimension_numbers = #tpu.dot_dimension_numbers<[1], [0], [0], [1], [0, 0, 1, 1], [], []>} : vector<16x128xbf16>, vector<128x128xbf16>, vector<16x128xf32> -> vector<16x128xf32>
    %10 = arith.addf %6, %9 : vector<16x128xf32>
    %c0_11 = arith.constant 0 : index
    %c0_12 = arith.constant 0 : index
    %11 = vector.load %arg5[%c0_11, %c0_12] : memref<1x128xf32, #tpu.memory_space<vmem>>, vector<1x128xf32>
    %12 = vector.broadcast %11 : vector<1x128xf32> to vector<16x128xf32>
    %13 = arith.addf %10, %12 : vector<16x128xf32>
    %cst_13 = arith.constant 0.000000e+00 : f32
    %14 = vector.broadcast %cst_13 : f32 to vector<16x128xf32>
    %15 = arith.maximumf %13, %14 : vector<16x128xf32>
    %16 = arith.truncf %15 : vector<16x128xf32> to vector<16x128xbf16>
    %c0_14 = arith.constant 0 : index
    %c0_15 = arith.constant 0 : index
    %17 = vector.load %arg6[%c0_14, %c0_15] : memref<128x64xbf16, #tpu.memory_space<vmem>>, vector<128x64xbf16>
    %cst_16 = arith.constant dense<0.000000e+00> : vector<16x64xf32>
    %18 = tpu.matmul %16, %17, %cst_16 {dimension_numbers = #tpu.dot_dimension_numbers<[1], [0], [0], [1], [0, 0, 1, 1], [], []>} : vector<16x128xbf16>, vector<128x64xbf16>, vector<16x64xf32> -> vector<16x64xf32>
    %c0_17 = arith.constant 0 : index
    %c0_18 = arith.constant 0 : index
    %19 = vector.load %arg7[%c0_17, %c0_18] : memref<1x64xf32, #tpu.memory_space<vmem>>, vector<1x64xf32>
    %20 = vector.broadcast %19 : vector<1x64xf32> to vector<16x64xf32>
    %21 = arith.addf %18, %20 : vector<16x64xf32>
    %cst_19 = arith.constant 0.000000e+00 : f32
    %22 = vector.broadcast %cst_19 : f32 to vector<16x64xf32>
    %23 = arith.maximumf %21, %22 : vector<16x64xf32>
    %24 = arith.truncf %23 : vector<16x64xf32> to vector<16x64xbf16>
    %c0_20 = arith.constant 0 : index
    %c0_21 = arith.constant 0 : index
    %25 = vector.load %arg8[%c0_20, %c0_21] : memref<64x128xbf16, #tpu.memory_space<vmem>>, vector<64x128xbf16>
    %cst_22 = arith.constant dense<0.000000e+00> : vector<16x128xf32>
    %26 = tpu.matmul %24, %25, %cst_22 {dimension_numbers = #tpu.dot_dimension_numbers<[1], [0], [0], [1], [0, 0, 1, 1], [], []>} : vector<16x64xbf16>, vector<64x128xbf16>, vector<16x128xf32> -> vector<16x128xf32>
    %c0_23 = arith.constant 0 : index
    %c0_24 = arith.constant 0 : index
    %27 = vector.load %arg9[%c0_23, %c0_24] : memref<1x128xf32, #tpu.memory_space<vmem>>, vector<1x128xf32>
    %28 = vector.broadcast %27 : vector<1x128xf32> to vector<16x128xf32>
    %29 = arith.addf %26, %28 : vector<16x128xf32>
    %c0_25 = arith.constant 0 : index
    %c0_26 = arith.constant 0 : index
    %30 = vector.load %arg11[%c0_25, %c0_26] : memref<16x128xf32, #tpu.memory_space<vmem>>, vector<16x128xf32>
    tpu.vector_store %arg11[%c0_25, %c0_26], %29 {strides = array<i32>} : memref<16x128xf32, #tpu.memory_space<vmem>>, vector<16x128xf32>,
    return
  }
  func.func @transform_0(%arg0: i32) -> (i32, i32) {
    %c0_i32 = arith.constant 0 : i32
    %c0_i32_0 = arith.constant 0 : i32
    return %arg0, %c0_i32 : i32, i32
  }
  func.func @transform_1(%arg0: i32) -> (i32, i32) {
    %c0_i32 = arith.constant 0 : i32
    %c0_i32_0 = arith.constant 0 : i32
    return %arg0, %c0_i32 : i32, i32
  }
  func.func @transform_2(%arg0: i32) -> (i32, i32) {
    %c0_i32 = arith.constant 0 : i32
    %c0_i32_0 = arith.constant 0 : i32
    %c0_i32_1 = arith.constant 0 : i32
    return %c0_i32, %c0_i32_0 : i32, i32
  }
  func.func @transform_3(%arg0: i32) -> (i32, i32) {
    %c0_i32 = arith.constant 0 : i32
    %c0_i32_0 = arith.constant 0 : i32
    %c0_i32_1 = arith.constant 0 : i32
    return %c0_i32, %c0_i32_0 : i32, i32
  }
  func.func @transform_4(%arg0: i32) -> (i32, i32) {
    %c0_i32 = arith.constant 0 : i32
    %c0_i32_0 = arith.constant 0 : i32
    %c0_i32_1 = arith.constant 0 : i32
    return %c0_i32, %c0_i32_0 : i32, i32
  }
  func.func @transform_5(%arg0: i32) -> (i32, i32) {
    %c0_i32 = arith.constant 0 : i32
    %c0_i32_0 = arith.constant 0 : i32
    %c0_i32_1 = arith.constant 0 : i32
    return %c0_i32, %c0_i32_0 : i32, i32
  }
  func.func @transform_6(%arg0: i32) -> (i32, i32) {
    %c0_i32 = arith.constant 0 : i32
    %c0_i32_0 = arith.constant 0 : i32
    %c0_i32_1 = arith.constant 0 : i32
    return %c0_i32, %c0_i32_0 : i32, i32
  }
  func.func @transform_7(%arg0: i32) -> (i32, i32) {
    %c0_i32 = arith.constant 0 : i32
    %c0_i32_0 = arith.constant 0 : i32
    %c0_i32_1 = arith.constant 0 : i32
    return %c0_i32, %c0_i32_0 : i32, i32
  }
  func.func @transform_8(%arg0: i32) -> (i32, i32) {
    %c0_i32 = arith.constant 0 : i32
    %c0_i32_0 = arith.constant 0 : i32
    %c0_i32_1 = arith.constant 0 : i32
    return %c0_i32, %c0_i32_0 : i32, i32
  }
  func.func @transform_9(%arg0: i32) -> (i32, i32) {
    %c0_i32 = arith.constant 0 : i32
    %c0_i32_0 = arith.constant 0 : i32
    return %arg0, %c0_i32 : i32, i32
  }
  func.func @transform_10(%arg0: i32) -> (i32, i32) {
    %c0_i32 = arith.constant 0 : i32
    %c0_i32_0 = arith.constant 0 : i32
    return %arg0, %c0_i32 : i32, i32
  }
}

</mosaic_0001>

<bundles_post_ra>
// kernel: tpu_custom_call.1
= control target key start
LH: loop header
LB: loop body
LE: loop exit
PB: predicated region body
PF: predicated region fallthrough
CT: control target
= control target key end

     0   :  { %s1683_s0 = inlined_call_operand.vmem [shape: f32[32,128], index: 0, kind: input, shape index: {}]   ;;  %s1684_s1 = inlined_call_operand.hbm [shape: f32[32,128], index: 1, kind: input, shape index: {}]   ;;  %s1685_s2 = inlined_call_operand.vmem [shape: bf16[128,128], index: 2, kind: input, shape index: {}]   ;;  %s1686_s3 = inlined_call_operand.hbm [shape: bf16[128,128], index: 3, kind: input, shape index: {}]   ;;  %s1687_s4 = inlined_call_operand.vmem [shape: f32[1,128], index: 4, kind: input, shape index: {}]   ;;  %s1688_s5 = inlined_call_operand.vmem [shape: bf16[128,64], index: 5, kind: input, shape index: {}]   ;;  %s1689_s6 = inlined_call_operand.vmem [shape: f32[1,64], index: 6, kind: input, shape index: {}]   ;;  %s1690_s7 = inlined_call_operand.hbm [shape: bf16[64,128], index: 7, kind: input, shape index: {}]   ;;  %s1691_s8 = inlined_call_operand.vmem [shape: f32[1,128], index: 8, kind: input, shape index: {}]   ;;  %s1692_s9 = inlined_call_operand.hbm [shape: f32[32,256], index: 9, kind: output, shape index: {0}]   ;;  %s1693_s10 = inlined_call_operand.hbm [shape: f32[32,128], index: 10, kind: output, shape index: {1}]  }
   0x1   :  { %1696 = sst [smem:[#allocation17_spill]] %s1683_s0 }
   0x2   :  { %1697 = sst [smem:[#allocation18_spill]] %s1686_s3 }
   0x3   :  { %1698 = sst [smem:[#allocation19_spill]] %s1690_s7 }
   0x4   :  { %16 = vsyncpa [#allocation3], 0 }
   0x5   :  { %18 = vsyncpa [#allocation3 + $0x1], 0 }
   0x6   :  { %19 = vsyncpa [#allocation6], 0 }
   0x7   :  { %20 = vsyncpa [#allocation4], 0 }
   0x8   :  { %22 = vsyncpa [#allocation4 + $0x1], 0 }
   0x9   :  { %23 = vsyncpa [#allocation10], 0 }
   0xa   :  { %25 = vsyncpa [#allocation10 + $0x1], 0  ;;  %s1454_s13 = smov 0   ;;  %s1456_s14 = smov 0  }
   0xb   :  { %s1458_s15 = smov 0   ;;  %s1460_s16 = smov 0  }
   0xc LB: > { %1699 = sst [smem:[#allocation15_spill]] %s1383_s15  ;;  %s1475_s17 = sadd.s32 4294967295, %s1387_s16   ;;  %s1387_s16 = sphi %s1460_s16, %s1715_s16   ;;  %s1383_s15 = sphi %s1458_s15, %s1712_s15   ;;  %s1379_s14 = sphi %s1456_s14, %s1714_s14   ;;  %s1375_s13 = sphi %s1454_s13, %s1713_s13  }
   0xd   : > { %s942_s18 = sadd.s32 4294967294, %s1387_s16   ;;  %p77_p0 = scmp.ne.s32.totalorder %s1379_s14, %s1375_s13 }
   0xe   : > { %p78_p1 = scmp.eq.s32.totalorder %s1475_s17, 0  ;;  %p248_p2 = scmp.eq.s32.totalorder %s1475_s17, 1 }
   0xf   : > { %p254_p3 = scmp.eq.s32.totalorder %s942_s18, 1  ;;  %p943_p5 = scmp.ge.s32.totalorder %s1387_s16, 1 }
  0x10   : > { %p1484_p4 = por %p78_p1, %p77_p0  ;;  %p287_p7 = scmp.lt.s32.totalorder %s1387_s16, 3 }
  0x11   : > { %p1489_p6 = por %p254_p3, %p77_p0  ;;  %s1702_s3 = sld [smem:[#allocation18_spill]] }
  0x12   : > { %p1497_p8 = pnand %p943_p5, %p287_p7  ;;  %s1389_s25 = smov [#allocation5]  }
  0x13   : > { %s303_s26 = sshll.u32 %s1389_s25, 4  ;;  %s1704_s7 = sld [smem:[#allocation19_spill]]  ;;  %s304_s26 = int_to_ptr.vmem [resolvable:$true] %s303_s26 }
  0x14   : > { %p1126_p9 = pneg %p1497_p8  ;;  %s1390_s30 = smov 64  }
  0x15   : > { %s1391_s11 = smov 4   ;;  %s1392_s12 = smov [#allocation7]  }
  0x16   : > { %p1127_p10 = pnand %p1126_p9, %p78_p1  ;;  %s326_s18 = sshll.u32 %s1392_s12, 4  ;;  %s327_s18 = int_to_ptr.vmem [resolvable:$true] %s326_s18 }
  0x17   : > { %s301_s23 = sshll.u32 %s1702_s3, 4  ;;  %s1510_s21 = sadd.s32 1, %s1387_s16   ;;  %s302_s23 = int_to_ptr.hbm [resolvable:$true] %s301_s23 }
  0x18   : > { %1129 = dma.hbm_to_vmem [thread:$0]  (!%p1127_p10), %s302_s23, 1024, %s304_s26, [#allocation6], %s1390_s30, %s1390_s30, %s1391_s11  }
  0x19   : > { %s324_s29 = sshll.u32 %s1704_s7, 4  ;;  %s64_s22 = sadd.s32 1, %s1383_s15  ;;  %s325_s29 = int_to_ptr.hbm [resolvable:$true] %s324_s29 }
  0x1a   : > { %1132 = dma.hbm_to_vmem [thread:$0]  (!%p1127_p10), %s325_s29, 512, %s327_s18, [#allocation6], %s1390_s30, %s1390_s30, %s1391_s11  }
  0x1b   : > { %s61_s25 = ssub.s32 %s1387_s16, %s1510_s21  ;;  %p71_p12 = scmp.ne.s32.totalorder %s1383_s15, %s1379_s14 }
  0x1c   : > { %p62_p13 = scmp.eq.s32.totalorder %s61_s25, 0  ;;  %p72_p0 = scmp.eq.s32.totalorder %s1387_s16, 0 }
  0x1d   : > { %p1520_p3 = por %p248_p2, %p71_p12  ;;  %p1146_p5 = scmp.lt.s32.totalorder %s1387_s16, 2 }
  0x1e   : > { %s1526_s23 = scalar_select %p62_p13, %s1383_s15, %s64_s22  }
  0x1f   : > { %p73_p7 = por %p72_p0, %p71_p12  ;;  %s352_s26 = sand.u32 1, %s1383_s15  }
  0x20   : > { %1706 = sst [smem:[#allocation16_spill]] %s1526_s23  ;;  %s947_s28 = sshll.u32 %s352_s26, 4 }
  0x21   : > { %s1080_s29 = sshll.u32 %s1387_s16, 4  ;;  %s356_s18 = scalar_lea.vmem [#allocation2], %s947_s28 }
  0x22   : > { %s361_s12 = scalar_lea.hbm %s1684_s1, %s1080_s29  ;;  %s364_s3 = sshll.u32 %s356_s18, 4  ;;  %s365_s3 = int_to_ptr.vmem [resolvable:$true] %s364_s3 }
  0x23   : > { %s362_s25 = sshll.u32 %s361_s12, 4  ;;  %p1533_p2 = pnand %p1146_p5, %p73_p7  ;;  %s363_s25 = int_to_ptr.hbm [resolvable:$true] %s362_s25 }
  0x24   : > { %s353_s22 = scalar_lea.sflag [#allocation3], %s352_s26  ;;  %s1255_s23 = sshra.s32 %s363_s25, 4  ;;  %s1256_s23 = int_to_ptr.hbm [resolvable:$true] %s1255_s23 }
  0x25   : > { %s1257_s15 = scalar_lea.hbm %s1256_s23, 16  ;;  %p1259_p10 = pneg %p1533_p2 }
  0x26   : > { %p1258_p9 = scmp.ne.s32.totalorder %s1256_s23, %s1257_s15  ;;  %s1262_s30 = scalar_lea.hbm %s1684_s1, 32 }
  0x27   : > { %p1263_p0 = scmp.lt.s32.totalorder %s1256_s23, %s1684_s1  ;;  %p1264_p5 = scmp.lt.s32.totalorder %s1262_s30, %s1257_s15 }
  0x28   : > { %p1260_p12 = pnand %p1259_p10, %p1258_p9 }
  0x29   : > { %p1265_p7 = por %p1264_p5, %p1263_p0 }
  0x2a   : > { %p1261_p13 = pneg %p1260_p12 }
  0x2c   : > { %p1266_p11 = pnand %p1265_p7, %p1261_p13 }
  0x2e   : > { %1269 = shalt.err (!%p1266_p11)
}
  0x2f   : > { %s1393_s26 = smov 128   ;;  %s1394_s18 = smov 8  }
  0x30   : > { %1136 = dma.hbm_to_vmem [thread:$0]  (!%p1533_p2), %s363_s25, 256, %s365_s3, %s353_s22, %s1393_s26, %s1393_s26, %s1394_s18  }
  0x31   : > { %376 = sbr.rel (%p1497_p8) target bundleno = 524 (0x20c), region = 56  ;;  %s1550_s29 = sand.u32 (!%p1497_p8), 1, %s1379_s14  }
  0x32   : > { %s1695_s23 = sshll.u32 (!%p1497_p8), %s1550_s29, 4  ;;  %s379_s15 = scalar_lea.sflag (!%p1497_p8), [#allocation3], %s1550_s29 }
  0x33   : > { %s382_s28 = scalar_lea.vmem (!%p1497_p8), [#allocation2], %s1695_s23 }
  0x36   : > { %1358 = dma.done.wait (%p1484_p4), %s379_s15, 256  }
  0x37   : > { %1360 = vsyncadd (%p1484_p4), %s379_s15, 4294967040 }
  0x38   : > { %1362 = dma.done.wait (%p78_p1), [#allocation6], 1536  }
  0x39   : > { %1364 = vsyncadd (%p78_p1), [#allocation6], 4294965760  ;;  %s956_s3 = sshll.u32 %s1475_s17, 1  ;;  %v1096_v0 = vld [vmem:[#allocation5 + $0x38] sm:$0xff]  ;;  %s954_s25 = sshll.u32 %s1550_s29, 5  ;;  %v1095_v2 = vld [vmem:[#allocation5 + $0x30] sm:$0xff] }
  0x3a   : > { %p441_p8 = scmp.lt.s32.totalorder %s956_s3, 3  ;;  %v1088_v1 = vld [vmem:[%s1685_s2 + $0x38] sm:$0xff]  ;;  %540 = vmatpush.bf16.msra.mxu0 %v1096_v0  ;;  %v1087_v3 = vld [vmem:[%s1685_s2 + $0x30] sm:$0xff]  ;;  %s1708_s0 = sld [smem:[#allocation17_spill]]  ;;  %v1094_v4 = vld [vmem:[#allocation5 + $0x28] sm:$0xff]  ;;  %vm746_vm0 = vcmask 523264  }
  0x3b   : > { %602 = vmatpush.bf16.msra.mxu1 %v1088_v1  ;;  %v452_v5 = vld [vmem:[%s382_s28] sm:$0xff]  ;;  %v1086_v6 = vld [vmem:[%s1685_s2 + $0x28] sm:$0xff]  ;;  %v1104_v8 = vld [vmem:[%s1688_s5 + $0x38] sm:$0xff]  ;;  %s1110_s11 = sshll.u32 %s1475_s17, 5  ;;  %s767_s7 = scalar_lea.sflag [#allocation4], %s1550_s29 }
  0x3c   : > { %s1717_s3 = smov (!%p441_p8, %s956_s3), 3  ;;  %v453_v7 = vld [vmem:[%s382_s28 + $0x8] sm:$0xff]  ;;  %v1103_v11 = vld [vmem:[%s1688_s5 + $0x30] sm:$0xff]  ;;  %693 = vmatpush.bf16.msra.mxu2 %v1104_v8  ;;  %v1093_v12 = vld [vmem:[#allocation5 + $0x20] sm:$0xff]  ;;  %s784_s18 = scalar_lea.hbm %s1692_s9, %s1110_s11 }
  0x3d   : > { %s957_s22 = sshll.u32 %s1717_s3, 3  ;;  %s1578_s3 = scalar_lea.vmem [#allocation8], %s954_s25  ;;  %v1085_v13 = vld [vmem:[%s1685_s2 + $0x20] sm:$0xff]  ;;  %v1102_v14 = vld [vmem:[%s1688_s5 + $0x28] sm:$0xff]  ;;  %v1092_v15 = vld [vmem:[#allocation5 + $0x18] sm:$0xff]  ;;  %v475_v24 = vpack.c.bf16 %v453_v7, %v452_v5 }
  0x3e   : > { %541 = vmatpush.bf16.msra.mxu0 %v1095_v2  ;;  %456 = vst [vmem:[%s1578_s3 + $0x8] sm:$0xff] %v452_v5  ;;  %v1084_v16 = vld [vmem:[%s1685_s2 + $0x18] sm:$0xff]  ;;  %v1101_v17 = vld [vmem:[%s1688_s5 + $0x20] sm:$0xff]  ;;  %v1091_v18 = vld [vmem:[#allocation5 + $0x10] sm:$0xff]  ;;  %s785_s30 = sshll.u32 %s1578_s3, 4  ;;  %s787_s15 = sshll.u32 %s784_s18, 4  ;;  %s786_s30 = int_to_ptr.vmem [resolvable:$true] %s785_s30  ;;  %s788_s15 = int_to_ptr.hbm [resolvable:$true] %s787_s15 }
  0x3f   : > { %603 = vmatpush.bf16.msra.mxu1 %v1087_v3  ;;  %457 = vst [vmem:[%s1578_s3 + $0x18] sm:$0xff] %v453_v7  ;;  %v1083_v19 = vld [vmem:[%s1685_s2 + $0x10] sm:$0xff]  ;;  %v1090_v20 = vld [vmem:[#allocation5 + $0x8] sm:$0xff]  ;;  %v1089_v22 = vld [vmem:[#allocation5] sm:$0xff]  ;;  %s1299_s24 = sshra.s32 %s788_s15, 4  ;;  %s1300_s24 = int_to_ptr.hbm [resolvable:$true] %s1299_s24 }
  0x40   : > { %s444_s26 = scalar_lea.vmem %s1708_s0, %s957_s22  ;;  %694 = vmatpush.bf16.msra.mxu2 %v1103_v11  ;;  %v1082_v21 = vld [vmem:[%s1685_s2 + $0x8] sm:$0xff]  ;;  %v1081_v23 = vld [vmem:[%s1685_s2] sm:$0xff]  ;;  %v1100_v26 = vld [vmem:[%s1688_s5 + $0x18] sm:$0xff]  ;;  %s1301_s22 = scalar_lea.hbm %s1300_s24, 32 }
  0x41   : > { %v450_v9 = vld [vmem:[%s444_s26] sm:$0xff]  ;;  %v451_v10 = vld [vmem:[%s444_s26 + $0x8] sm:$0xff]  ;;  %v1099_v27 = vld [vmem:[%s1688_s5 + $0x10] sm:$0xff]  ;;  %p1302_p1 = scmp.ne.s32.totalorder %s1300_s24, %s1301_s22  ;;  %p1306_p2 = scmp.lt.s32.totalorder %s1300_s24, %s1692_s9 }
  0x42   : > { %454 = vst [vmem:[%s1578_s3] sm:$0xff] %v450_v9  ;;  %542 = vmatpush.bf16.msra.mxu0 %v1094_v4  ;;  %v458_v25 = vpack.c.bf16 %v451_v10, %v450_v9  ;;  %v1098_v28 = vld [vmem:[%s1688_s5 + $0x8] sm:$0xff]  ;;  %v1097_v29 = vld [vmem:[%s1688_s5] sm:$0xff]  ;;  %v1108_v42 = vld [vmem:[#allocation7 + $0x18] sm:$0xff] }
  0x43   : > { %455 = vst [vmem:[%s1578_s3 + $0x10] sm:$0xff] %v451_v10  ;;  %604 = vmatpush.bf16.msra.mxu1 %v1086_v6  ;;  %v1192_v33 = vld [vmem:[%s1687_s4] ss:$0 sm:$0xff]  ;;  %754 = vmatpush.bf16.msra.mxu3 %v1108_v42  ;;  %v1107_v43 = vld [vmem:[#allocation7 + $0x10] sm:$0xff]  ;;  %v1106_v44 = vld [vmem:[#allocation7 + $0x8] sm:$0xff]  ;;  %p1303_p4 = pnand %p1302_p1, %p1520_p3  ;;  %s1305_s3 = scalar_lea.hbm %s1692_s9, 64 }
  0x44   : > { %695 = vmatpush.bf16.msra.mxu2 %v1102_v14  ;;  %v1105_v45 = vld [vmem:[#allocation7] sm:$0xff]  ;;  %p1307_p9 = scmp.lt.s32.totalorder %s1305_s3, %s1301_s22 }
  0x45   : > { %v1193_v47 = vld [vmem:[%s1689_s6] ss:$0 sm:$0xff]  ;;  %p1304_p11 = pneg %p1303_p4 }
  0x46   : > { %543 = vmatpush.bf16.msra.mxu0 %v1093_v12  ;;  %p1308_p10 = por %p1307_p9, %p1306_p2 }
  0x47   : > { %605 = vmatpush.bf16.msra.mxu1 %v1085_v13  ;;  %755 = vmatpush.bf16.msra.mxu3 %v1107_v43 }
  0x48   : > { %696 = vmatpush.bf16.msra.mxu2 %v1101_v17  ;;  %p1309_p12 = pnand %p1308_p10, %p1304_p11 }
  0x4a   : > { %544 = vmatpush.bf16.msra.mxu0 %v1092_v15 }
  0x4b   : > { %606 = vmatpush.bf16.msra.mxu1 %v1084_v16  ;;  %756 = vmatpush.bf16.msra.mxu3 %v1106_v44 }
  0x4c   : > { %697 = vmatpush.bf16.msra.mxu2 %v1100_v26 }
  0x4e   : > { %545 = vmatpush.bf16.msra.mxu0 %v1091_v18 }
  0x4f   : > { %607 = vmatpush.bf16.msra.mxu1 %v1083_v19  ;;  %757 = vmatpush.bf16.msra.mxu3 %v1105_v45 }
  0x50   : > { %698 = vmatpush.bf16.msra.mxu2 %v1099_v27 }
  0x52   : > { %546 = vmatpush.bf16.msra.mxu0 %v1090_v20 }
  0x53   : > { %608 = vmatpush.bf16.msra.mxu1 %v1082_v21 }
  0x54   : > { %699 = vmatpush.bf16.msra.mxu2 %v1098_v28 }
  0x56   : > { %547 = vmatpush.bf16.msra.mxu0 %v1089_v22 }
  0x57   : > { %609 = vmatpush.bf16.msra.mxu1 %v1081_v23 }
  0x58   : > { %700 = vmatpush.bf16.msra.mxu2 %v1097_v29 }
  0x59   : > { %548 = vmatmul.bf16.vlgmr.msra.gmra.mxu0 %v475_v24 }
  0x5a   : > { %610 = vmatmul.bf16.vlgmr.msra.gmra.mxu1 %v458_v25 }
  0xd6   : > { %v549_v30 = vpop.f32.mrf.mxu0 }
  0xd7   : > { %v611_v31 = vpop.f32.mrf.mxu1 }
  0xd8   : > { %v612_v32 = vadd.f32 %v611_v31, %v549_v30 }
  0xda   : > { %v620_v36 = vadd.f32 %v1192_v33, %v612_v32 }
  0xdc   : > { %v622_v39 = vmax.f32 %v620_v36, 0.0 }
  0xde   : > { %v551_v34 = vpop.f32.mrf.mxu0 }
  0xdf   : > { %v613_v35 = vpop.f32.mrf.mxu1 }
  0xe0   : > { %v614_v37 = vadd.f32 %v613_v35, %v551_v34 }
  0xe2   : > { %v621_v38 = vadd.f32 %v1192_v33, %v614_v37 }
  0xe4   : > { %v623_v40 = vmax.f32 %v621_v38, 0.0 }
  0xe6   : > { %v624_v41 = vpack.c.bf16 %v623_v40, %v622_v39 }
  0xe8   : > { %701 = vmatmul.bf16.vlgmr.msra.gmra.mxu2 %v624_v41 }
 0x16b   : > { %v702_v46 = vpop.f32.mrf.mxu2 }
 0x16c   : > { %v703_v48 = vadd.f32 %v1193_v47, %v702_v46 }
 0x16e   : > { %v707_v51 = vmax.f32 %v703_v48, 0.0 }
 0x173   : > { %v704_v49 = vpop.f32.mrf.mxu2 }
 0x174   : > { %v705_v50 = vadd.f32 %v1193_v47, %v704_v49 }
 0x176   : > { %v708_v52 = vmax.f32 %v705_v50, 0.0 }
 0x178   : > { %v709_v53 = vpack.c.bf16 %v708_v52, %v707_v51 }
 0x17a   : > { %1070 = vmatmul.msk.bf16.vlgmr.msra.gmra.mxu3 %vm746_vm0, %v709_v53 }
 0x17b   : > { %1312 = shalt.err (!%p1309_p12)
}
 0x17c   : > { %s1395_s11 = smov 256   ;;  %s1396_s12 = smov 16   ;;  %v1194_v54 = vld [vmem:[%s1691_s8] ss:$0 sm:$0xff] }
 0x17d   : > { %1122 = dma.vmem_to_hbm [thread:$0]  (%p1520_p3), %s786_s30, 512, %s788_s15, %s767_s7, %s1395_s11, %s1395_s11, %s1396_s12  }
 0x17e   : > { %s1111_s19 = sshll.u32 %s1475_s17, 4  ;;  %s1709_s28 = sshll.u32 %s1550_s29, 4 }
 0x17f   : > { %s801_s22 = scalar_lea.hbm %s1693_s10, %s1111_s19  ;;  %s439_s3 = scalar_lea.vmem [#allocation9], %s1709_s28 }
 0x180   : > { %s802_s25 = sshll.u32 %s439_s3, 4  ;;  %s804_s0 = sshll.u32 %s801_s22, 4  ;;  %s803_s25 = int_to_ptr.vmem [resolvable:$true] %s802_s25  ;;  %s805_s0 = int_to_ptr.hbm [resolvable:$true] %s804_s0 }
 0x181   : > { %s772_s30 = scalar_lea.sflag [#allocation10], %s1550_s29  ;;  %s1327_s15 = sshra.s32 %s805_s0, 4  ;;  %s1328_s15 = int_to_ptr.hbm [resolvable:$true] %s1327_s15 }
 0x182   : > { %s1329_s17 = scalar_lea.hbm %s1328_s15, 16  ;;  %s1333_s12 = scalar_lea.hbm %s1693_s10, 32 }
 0x183   : > { %p1330_p13 = scmp.ne.s32.totalorder %s1328_s15, %s1329_s17  ;;  %p1334_p7 = scmp.lt.s32.totalorder %s1328_s15, %s1693_s10 }
 0x184   : > { %p1335_p8 = scmp.lt.s32.totalorder %s1333_s12, %s1329_s17 }
 0x185   : > { %p1331_p0 = pnand %p1330_p13, %p1520_p3 }
 0x186   : > { %p1336_p1 = por %p1335_p8, %p1334_p7 }
 0x187   : > { %p1332_p5 = pneg %p1331_p0 }
 0x189   : > { %p1337_p4 = pnand %p1336_p1, %p1332_p5 }
 0x1fd   : > { %v759_v55 = vpop.f32.mrf.mxu3 }
 0x1fe   : > { %v760_v56 = vadd.f32 %v1194_v54, %v759_v55 }
 0x200   : > { %764 = vst [vmem:[%s439_s3] sm:$0xff] %v760_v56 }
 0x205   : > { %v761_v57 = vpop.f32.mrf.mxu3 }
 0x206   : > { %v762_v58 = vadd.f32 %v1194_v54, %v761_v57 }
 0x208   : > { %765 = vst [vmem:[%s439_s3 + $0x8] sm:$0xff] %v762_v58 }
 0x209   : > { %1340 = shalt.err (!%p1337_p4)
}
 0x20a   : > { %s1397_s29 = smov 128   ;;  %s1398_s19 = smov 8  }
 0x20b   : > { %1123 = dma.vmem_to_hbm [thread:$0]  (%p1520_p3), %s803_s25, 256, %s805_s0, %s772_s30, %s1397_s29, %s1397_s29, %s1398_s19  }
 0x20c PF: > { %s819_s23 = sand.u32 1, %s1375_s13   ;;  %p1710_p11 = scmp.ge.s32.totalorder %s1387_s16, 2 }
 0x20d   : > { %s820_s24 = scalar_lea.sflag [#allocation4], %s819_s23 }
 0x20e   : > { %p1138_p2 = pnand %p1710_p11, %p1489_p6 }
 0x210   : > { %p1139_p9 = pneg %p1138_p2 }
 0x212   : > { %1366 = dma.done.wait (%p1139_p9), %s820_s24, 512  }
 0x213   : > { %1368 = vsyncadd (%p1139_p9), %s820_s24, 4294966784  ;;  %s830_s22 = scalar_lea.sflag [#allocation10], %s819_s23 }
 0x214   : > { %1370 = dma.done.wait (%p1139_p9), %s830_s22, 256  }
 0x215   : > { %1372 = vsyncadd (%p1139_p9), %s830_s22, 4294967040  ;;  %s1711_s28 = sld [smem:[#allocation15_spill]]  ;;  %p28_p3 = scmp.ge.s32.totalorder %s1510_s21, 4  }
 0x216   : > { %s1712_s15 = sld [smem:[#allocation16_spill]]  ;;  %s1713_s13 = smov %s1379_s14 }
 0x217   : > { %s1715_s16 = smov %s1510_s21  ;;  %30 = sbr.rel (!%p28_p3) target bundleno = 12 (0xc), region = 129 }
 0x21b   : > { %s1714_s14 = smov %s1711_s28 }
 0x21c   :  { %836 = vsyncpa [#allocation3], 1 }
 0x21d   :  { %838 = vsyncpa [#allocation3 + $0x1], 1 }
 0x21e   :  { %839 = vsyncpa [#allocation6], 1 }
 0x21f   :  { %840 = vsyncpa [#allocation4], 1 }
 0x220   :  { %842 = vsyncpa [#allocation4 + $0x1], 1 }
 0x221   :  { %843 = vsyncpa [#allocation10], 1 }
 0x222   :  { %845 = vsyncpa [#allocation10 + $0x1], 1 }

</bundles_post_ra>
